<compile_context>
chip_gen: v7x
topology: tpu7x:2x2x1
jax: 0.10.0
libtpu: 0.0.40
codegen_flags: <defaults>
</compile_context>

<pallas_src>
import math
import functools

import jax
import jax.numpy as jnp
from jax.experimental import pallas as pl
from jax.experimental.pallas import tpu as pltpu


def _pos_enc_kernel(x_ref, pe_ref, o_ref, *, scale):
    # x_ref, o_ref: (B, tR, C) tile; pe_ref: (tR, C) tile.
    # (tR, C) broadcasts against (B, tR, C) over the leading dim -> no
    # cross-sublane work, pure VPU multiply-add.
    o_ref[...] = x_ref[...] * scale + pe_ref[...]


def make_positional_encoding(d_model, max_len=1024, dtype=jnp.float32):
    """Builds the sinusoidal table, pre-flattened and pre-cast (setup-time glue).

    Returns a 1-D array of length max_len * d_model in the activation dtype.
    """
    pos = jnp.arange(0, max_len, dtype=jnp.float32)[:, None]                 # (L, 1)
    div_term = 1.0 / jnp.power(
        10000.0, jnp.arange(0, d_model, 2, dtype=jnp.float32) / d_model)     # (D/2,)
    angles = pos * div_term                                                  # (L, D/2)
    pe = jnp.zeros((max_len, d_model), dtype=jnp.float32)
    pe = pe.at[:, 0::2].set(jnp.sin(angles))
    pe = pe.at[:, 1::2].set(jnp.cos(angles))
    return pe.reshape(-1).astype(dtype)                                      # (L * D,)


def _padded_block_bytes(shape, itemsize):
    """Physical VMEM bytes of a block after (8, 128) sublane/lane padding."""
    s = list(shape)
    s[-1] = -(-s[-1] // 128) * 128
    if len(s) >= 2:
        s[-2] = -(-s[-2] // 8) * 8
    n = 1
    for d in s:
        n *= d
    return n * itemsize


def positional_encoder_forward(x, pe_flat, d_model, *, target_tile_bytes=4 << 20):
    """x: (B, S, D); pe_flat: pre-flattened/pre-cast table of length >= S*D."""
    B, S, D = x.shape
    assert D == d_model
    dtype = x.dtype
    itemsize = jnp.dtype(dtype).itemsize
    SD = S * D

    # Factor the flattened (S*D) axis into (R, C) with C lane-dense.
    if SD % 128 == 0:
        C = 128
        R = SD // 128
    else:
        # TODO(synk): non-128-divisible S*D falls back to one full-extent block.
        C = SD
        R = 1

    # Row-tile: ~target_tile_bytes per x block, in multiples of 8 sublanes.
    tR = target_tile_bytes // max(1, B * C * itemsize)
    tR = max(8, (tR // 8) * 8)
    # Keep several grid steps for large inputs (overhead amortization + v7x megacore).
    if R >= 32:
        tR = min(tR, max(8, ((R // 4) // 8) * 8))
    elif R >= 16:
        tR = min(tR, max(8, ((R // 2) // 8) * 8))
    tR = min(tR, R)
    if R < 8:
        tR = R  # full-extent block; permitted by the full-dim exception.

    # Shrink if (rare: huge B) the double-buffered streams exceed the budget.
    vmem_budget = 40 << 20
    def _needed(tr):
        xb = _padded_block_bytes((B, tr, C), itemsize)
        pb = _padded_block_bytes((tr, C), itemsize)
        return 2 * (2 * xb + pb)          # in + out + pe, double-buffered
    while tR > 8 and _needed(tR) > vmem_budget:
        tR = max(8, ((tR // 2) // 8) * 8)

    num_tiles = pl.cdiv(R, tR)

    x3 = x.reshape(B, R, C)
    # Prefix slice of the pre-flattened, pre-cast table (free); the astype is a
    # no-op when dtypes already match.
    pe2 = pe_flat[:SD].astype(dtype).reshape(R, C)

    vmem_needed = _needed(tR)
    vmem_limit = int(min(max(vmem_needed + (8 << 20), 16 << 20), 48 << 20))

    kernel = functools.partial(_pos_enc_kernel, scale=math.sqrt(d_model))

    out3 = pl.pallas_call(
        kernel,
        out_shape=jax.ShapeDtypeStruct((B, R, C), dtype),
        grid_spec=pltpu.PrefetchScalarGridSpec(
            num_scalar_prefetch=0,
            grid=(num_tiles,),
            in_specs=[
                pl.BlockSpec((B, tR, C), lambda i: (0, i, 0)),   # x: all batch rows, row-tile i
                pl.BlockSpec((tR, C), lambda i: (i, 0)),         # pe: read exactly once
            ],
            out_specs=pl.BlockSpec((B, tR, C), lambda i: (0, i, 0)),
        ),
        compiler_params=pltpu.CompilerParams(
            dimension_semantics=("parallel",),
            vmem_limit_bytes=vmem_limit,
        ),
    )(x3, pe2)

    return out3.reshape(B, S, D)


if __name__ == "__main__":
    key = jax.random.PRNGKey(0)

    # --- main check: lane-dense path (S*D divisible by 128) ---
    d_model, max_len = 32, 1024
    batch, seq = 2, 8
    x = jax.random.normal(key, (batch, seq, d_model), dtype=jnp.float32)
    pe_flat = make_positional_encoding(d_model, max_len, dtype=x.dtype)

    out = positional_encoder_forward(x, pe_flat, d_model)
    out = jax.block_until_ready(out)

    pe_table = pe_flat.reshape(1, max_len, d_model)
    ref = x * math.sqrt(d_model) + pe_table[:, :seq, :]
    assert out.shape == (batch, seq, d_model)
    assert jnp.allclose(out, ref, atol=1e-5, rtol=1e-5)

    # --- secondary check: S*D not a multiple of 128 (fallback full-block path) ---
    d_model2, max_len2 = 24, 64
    batch2, seq2 = 3, 5
    x2 = jax.random.normal(jax.random.PRNGKey(1), (batch2, seq2, d_model2),
                           dtype=jnp.float32)
    pe_flat2 = make_positional_encoding(d_model2, max_len2, dtype=x2.dtype)
    out2 = jax.block_until_ready(positional_encoder_forward(x2, pe_flat2, d_model2))
    pe_table2 = pe_flat2.reshape(1, max_len2, d_model2)
    ref2 = x2 * math.sqrt(d_model2) + pe_table2[:, :seq2, :]
    assert jnp.allclose(out2, ref2, atol=1e-5, rtol=1e-5)

    print("KERNEL_OK")
</pallas_src>

<mosaic_0001>
module attributes {stable_mosaic.version = 11 : i64} {
  func.func @_pos_enc_kernel(%arg0: i32, %arg1: memref<2x2x128xf32, #tpu.memory_space<vmem>>, %arg2: memref<2x128xf32, #tpu.memory_space<vmem>>, %arg3: memref<2x2x128xf32, #tpu.memory_space<vmem>>) attributes {dimension_semantics = [#tpu.dimension_semantics<parallel>], iteration_bounds = array<i64: 1>, scalar_prefetch = 0 : i64, scratch_operands = 0 : i64, tpu.core_type = #tpu.core_type<tc>, window_params = [{transform_indices = @transform_0, window_bounds = array<i64: 2, 2, 128>}, {transform_indices = @transform_1, window_bounds = array<i64: 2, 128>}, {transform_indices = @transform_2, window_bounds = array<i64: 2, 2, 128>}]} {
    %c0 = arith.constant 0 : index
    %c0_0 = arith.constant 0 : index
    %c0_1 = arith.constant 0 : index
    %0 = vector.load %arg1[%c0, %c0_0, %c0_1] : memref<2x2x128xf32, #tpu.memory_space<vmem>>, vector<2x2x128xf32>
    %cst = arith.constant 5.65685415 : f32
    %1 = vector.broadcast %cst : f32 to vector<2x2x128xf32>
    %2 = arith.mulf %0, %1 : vector<2x2x128xf32>
    %c0_2 = arith.constant 0 : index
    %c0_3 = arith.constant 0 : index
    %3 = vector.load %arg2[%c0_2, %c0_3] : memref<2x128xf32, #tpu.memory_space<vmem>>, vector<2x128xf32>
    %4 = vector.shape_cast %3 : vector<2x128xf32> to vector<1x2x128xf32>
    %5 = vector.broadcast %4 : vector<1x2x128xf32> to vector<2x2x128xf32>
    %6 = arith.addf %2, %5 : vector<2x2x128xf32>
    %c0_4 = arith.constant 0 : index
    %c0_5 = arith.constant 0 : index
    %c0_6 = arith.constant 0 : index
    %7 = vector.load %arg3[%c0_4, %c0_5, %c0_6] : memref<2x2x128xf32, #tpu.memory_space<vmem>>, vector<2x2x128xf32>
    tpu.vector_store %arg3[%c0_4, %c0_5, %c0_6], %6 {strides = array<i32>} : memref<2x2x128xf32, #tpu.memory_space<vmem>>, vector<2x2x128xf32>,
    return
  }
  func.func @transform_0(%arg0: i32) -> (i32, i32, i32) {
    %c0_i32 = arith.constant 0 : i32
    %c0_i32_0 = arith.constant 0 : i32
    %c0_i32_1 = arith.constant 0 : i32
    return %c0_i32, %arg0, %c0_i32_0 : i32, i32, i32
  }
  func.func @transform_1(%arg0: i32) -> (i32, i32) {
    %c0_i32 = arith.constant 0 : i32
    %c0_i32_0 = arith.constant 0 : i32
    return %arg0, %c0_i32 : i32, i32
  }
  func.func @transform_2(%arg0: i32) -> (i32, i32, i32) {
    %c0_i32 = arith.constant 0 : i32
    %c0_i32_0 = arith.constant 0 : i32
    %c0_i32_1 = arith.constant 0 : i32
    return %c0_i32, %arg0, %c0_i32_0 : i32, i32, i32
  }
}

</mosaic_0001>

<bundles_post_ra>
// kernel: tpu_custom_call.1
= control target key start
LH: loop header
LB: loop body
LE: loop exit
PB: predicated region body
PF: predicated region fallthrough
CT: control target
= control target key end

     0   :  { %7 = vsyncpa [#allocation3], 0  ;;  %s156_s0 = inlined_call_operand.hbm [shape: f32[2,2,128], index: 0, kind: input, shape index: {}]   ;;  %s157_s1 = inlined_call_operand.vmem [shape: f32[2,128], index: 1, kind: input, shape index: {}]   ;;  %s158_s2 = inlined_call_operand.hbm [shape: f32[2,2,128], index: 2, kind: output, shape index: {}]  }
   0x1   :  { %8 = vsyncpa [#allocation4], 0  ;;  %s104_s9 = smov [#allocation2]   ;;  %s56_s13 = scalar_lea.hbm %s156_s0, 64 }
   0x2   :  { %s14_s10 = sshll.u32 %s104_s9, 4  ;;  %p57_p0 = scmp.ne.s32.totalorder %s156_s0, %s56_s13  ;;  %s15_s10 = int_to_ptr.vmem [resolvable:$true] %s14_s10 }
   0x3   :  { %p60_p1 = scmp.lt.u32.totalorder %s56_s13, %s156_s0 }
   0x5   :  { %p62_p2 = pnand %p60_p1, %p57_p0 }
   0x7   :  { %65 = shalt.err (!%p62_p2)
}
   0x8   :  { %s66_s18 = scalar_lea.vmem %s15_s10, 64  ;;  %p71_p4 = scmp.lt.s32.totalorder %s15_s10, %s15_s10 }
   0x9   :  { %p67_p3 = scmp.ne.s32.totalorder %s15_s10, %s66_s18  ;;  %p72_p5 = scmp.lt.s32.totalorder %s66_s18, %s66_s18 }
   0xb   :  { %p73_p6 = por %p72_p5, %p71_p4 }
   0xd   :  { %p74_p7 = pnand %p73_p6, %p67_p3 }
   0xf   :  { %77 = shalt.err (!%p74_p7)
}
  0x10   :  { %s105_s19 = smov 32   ;;  %s106_s20 = smov 2  }
  0x11   :  { %20 = dma.hbm_to_vmem [thread:$0]  %s156_s0, 64, %s15_s10, [#allocation3], %s105_s19, %s105_s19, %s106_s20  }
  0x12   :  { %100 = dma.done.wait [#allocation3], 64  }
  0x13   :  { %101 = vsyncadd [#allocation3], 4294967232  ;;  %s107_s23 = smov [#allocation5]   ;;  %v26_v0 = vld [vmem:[#allocation2] sm:$0x3] }
  0x14   :  { %s40_s24 = sshll.u32 %s107_s23, 4  ;;  %v30_v1 = vld [vmem:[%s157_s1] sm:$0x3]  ;;  %v27_v2 = vld [vmem:[#allocation2 + $0x2] sm:$0x3]  ;;  %s41_s24 = int_to_ptr.vmem [resolvable:$true] %s40_s24 }
  0x15   :  { %v28_v3 = vmul.f32 5.656854, %v26_v0  ;;  %v29_v4 = vmul.f32 5.656854, %v27_v2  ;;  %s78_s27 = scalar_lea.vmem %s41_s24, 64  ;;  %p83_p9 = scmp.lt.s32.totalorder %s41_s24, %s41_s24 }
  0x16   :  { %p79_p8 = scmp.ne.s32.totalorder %s41_s24, %s78_s27  ;;  %p84_p10 = scmp.lt.s32.totalorder %s78_s27, %s78_s27 }
  0x17   :  { %v31_v5 = vadd.f32 %v30_v1, %v28_v3  ;;  %v32_v6 = vadd.f32 %v30_v1, %v29_v4 }
  0x18   :  { %p85_p11 = por %p84_p10, %p83_p9 }
  0x19   :  { %33 = vst [vmem:[#allocation5] sm:$0x3] %v31_v5  ;;  %34 = vst [vmem:[#allocation5 + $0x2] sm:$0x3] %v32_v6 }
  0x1a   :  { %p86_p12 = pnand %p85_p11, %p79_p8 }
  0x1c   :  { %89 = shalt.err (!%p86_p12)
}
  0x1d   :  { %s90_s29 = scalar_lea.hbm %s158_s2, 64 }
  0x1e   :  { %p91_p13 = scmp.ne.s32.totalorder %s158_s2, %s90_s29  ;;  %p94_p0 = scmp.lt.u32.totalorder %s90_s29, %s158_s2 }
  0x20   :  { %p96_p1 = pnand %p94_p0, %p91_p13 }
  0x22   :  { %99 = shalt.err (!%p96_p1)
}
  0x23   :  { %46 = dma.vmem_to_hbm [thread:$0]  %s41_s24, 64, %s158_s2, [#allocation4], %s105_s19, %s105_s19, %s106_s20  }
  0x24   :  { %102 = dma.done.wait [#allocation4], 64  }
  0x25   :  { %103 = vsyncadd [#allocation4], 4294967232 }
  0x26   :  { %50 = vsyncpa [#allocation3], 1 }
  0x27   :  { %51 = vsyncpa [#allocation4], 1 }

</bundles_post_ra>
